<compile_context>
chip_gen: v6e
topology: v6e:2x2x1
jax: 0.10.0
libtpu: 0.0.40
codegen_flags: <defaults>
</compile_context>

<pallas_src>
import jax
import jax.numpy as jnp
from jax.experimental import pallas as pl
from jax.experimental.pallas import tpu as pltpu


def _affine_kernel(x_ref, u_ref, c_ref, o_ref):
    # x_ref : (TR, TM) activation tile
    # u_ref : (TR, 1) or (1, TM) f32 scale, broadcast by the VPU
    # c_ref : (TR, 1) or (1, TM) f32 shift
    x = x_ref[...].astype(jnp.float32)
    o_ref[...] = (x * u_ref[...] + c_ref[...]).astype(o_ref.dtype)


def _vmem_capacity_bytes():
    """Physical VMEM capacity (per TensorCore); conservative fallback."""
    try:
        info = pltpu.get_tpu_info()
        cap = getattr(info, "vmem_capacity_bytes", None)
        if cap:
            return int(cap)
    except Exception:
        pass
    return 64 << 20  # v7x per-TC value: safe lower bound for all generations


def _choose_tiles(R, M, itemsize, target_block_bytes, min_total_blocks=8):
    """Pick a (row, lane) tile for an (R, M) slab.

    Legality: each tile dim is a multiple of the hardware tile (sublane step
    for rows, 128 for lanes) or equals the full extent.  Tail blocks are
    handled by cdiv + masking, so tiles need not divide R / M.
    """
    sub = max(8, 32 // max(itemsize, 1))     # 8 f32, 16 bf16/f16, 32 int8/fp8
    min_tr = sub if R >= sub else R
    min_tm = 128 if M >= 128 else M

    # Lane tile: prefer the full row (contiguous HBM DMA) when it fits.
    if M <= 128 or M * itemsize <= target_block_bytes:
        tm = M
    else:
        tm = max(128, (target_block_bytes // (itemsize * 128)) * 128)

    # Row tile: fill the remaining byte budget.
    if R <= sub:
        tr = R
    else:
        budget_rows = max(1, target_block_bytes // max(tm * itemsize, 1))
        tr = max(sub, (budget_rows // sub) * sub)
        if tr >= R:
            tr = R                            # full extent is always legal

    # Guarantee enough grid steps for pipelining / megacore sharding.
    def nblocks(a, b):
        return pl.cdiv(R, a) * pl.cdiv(M, b)

    while nblocks(tr, tm) < min_total_blocks:
        if tr > min_tr:
            tr = max(min_tr, ((tr // 2) // sub) * sub or min_tr)
        elif tm > min_tm:
            tm = max(min_tm, ((tm // 2) // 128) * 128 or min_tm)
        else:
            break
    return tr, tm


def _pallas_affine_2d(x2d, u2d, c2d, tr, tm, params_along_rows, vmem_limit):
    R, M = x2d.shape
    gr, gm = pl.cdiv(R, tr), pl.cdiv(M, tm)

    if params_along_rows:
        # Params vary with the row block only -> iterate lane blocks innermost
        # so the param block index stays constant across the inner loop.
        grid = (gr, gm)
        x_map = lambda i, j: (i, j)
        p_map = lambda i, j: (i, 0)
        o_map = lambda i, j: (i, j)
        p_block = (tr, 1)
    else:
        # Params vary with the lane block only -> iterate row blocks innermost.
        grid = (gm, gr)
        x_map = lambda j, i: (i, j)
        p_map = lambda j, i: (0, j)
        o_map = lambda j, i: (i, j)
        p_block = (1, tm)

    return pl.pallas_call(
        _affine_kernel,
        out_shape=jax.ShapeDtypeStruct((R, M), x2d.dtype),
        grid_spec=pltpu.PrefetchScalarGridSpec(
            num_scalar_prefetch=0,
            grid=grid,
            in_specs=[
                pl.BlockSpec((tr, tm), x_map),   # lane-dense activations
                pl.BlockSpec(p_block, p_map),    # scale
                pl.BlockSpec(p_block, p_map),    # shift
            ],
            out_specs=pl.BlockSpec((tr, tm), o_map),
        ),
        compiler_params=pltpu.CompilerParams(
            dimension_semantics=("parallel", "parallel"),
            vmem_limit_bytes=vmem_limit,
        ),
    )(x2d, u2d, c2d)


def constraint_affine(x_nchw, u, c, *, target_block_bytes=None):
    """y = x * u + c with per-channel (dim-1) broadcast; NCHW in, NCHW out."""
    N, C, H, W = x_nchw.shape
    L = H * W
    itemsize = x_nchw.dtype.itemsize

    cap = _vmem_capacity_bytes()
    if target_block_bytes is None:
        # v7x (64 MiB/TC): ~4 MiB blocks.  v5e/v6e (128 MiB): ~8 MiB blocks.
        target_block_bytes = (4 << 20) if cap <= (64 << 20) else (8 << 20)
    # Double-buffered in + out live ~= 4x block; never let that exceed ~cap/2.
    target_block_bytes = min(target_block_bytes, cap // 8)
    target_block_bytes = max(target_block_bytes, 128 * 128 * 4)

    lane_dense = (L >= 128) and (L % 128 == 0)
    if lane_dense:
        # Path A: each row is one (n, c) image plane; lanes are H*W.
        R, M = N * C, L
        x2d = x_nchw.reshape(R, M)
        # row r = n*C + ch  ->  channel ch = r % C, so tile(u, N) is correct.
        u2d = jnp.tile(u.astype(jnp.float32), N).reshape(R, 1)
        c2d = jnp.tile(c.astype(jnp.float32), N).reshape(R, 1)
        params_along_rows = True
    else:
        # Path B: small / unaligned spatial dims.  Rows are batch items, lanes
        # are C*H*W; params repeated per-spatial so the row stays lane-dense.
        R, M = N, C * L
        x2d = x_nchw.reshape(R, M)
        u2d = jnp.repeat(u.astype(jnp.float32), L).reshape(1, M)
        c2d = jnp.repeat(c.astype(jnp.float32), L).reshape(1, M)
        params_along_rows = False

    tr, tm = _choose_tiles(R, M, itemsize, target_block_bytes)

    # Derive the scoped-VMEM limit from actual live bytes:
    #   2 bufs x (x block + out block) + 2 bufs x 2 padded param blocks + slack
    block_bytes = tr * tm * itemsize
    if params_along_rows:
        param_buf = ((tr + 7) // 8 * 8) * 128 * 4          # (tr,1) pads lanes
    else:
        param_buf = 8 * ((tm + 127) // 128 * 128) * 4      # (1,tm) pads sublanes
    needed = 4 * block_bytes + 4 * param_buf + (8 << 20)
    vmem_limit = int(min(max(needed, 32 << 20), max(cap - (8 << 20), 32 << 20)))

    out2d = _pallas_affine_2d(x2d, u2d, c2d, tr, tm, params_along_rows, vmem_limit)
    return out2d.reshape(N, C, H, W)


if __name__ == "__main__":
    key = jax.random.PRNGKey(0)
    kx, ku, kc, kx2, ku2, kc2 = jax.random.split(key, 6)

    # --- Path A: lane-dense spatial dims (H*W = 256, multiple of 128) ---
    N, C, H, W = 2, 4, 16, 16
    x = jax.random.normal(kx, (N, C, H, W), dtype=jnp.float32)

    # Parameters exactly as the module's __init__: c_ = 0, u_ = 1 (per channel).
    c_param = jnp.zeros((C,), dtype=jnp.float32)
    u_param = jnp.ones((C,), dtype=jnp.float32)

    y = jax.block_until_ready(constraint_affine(x, u_param, c_param))
    y_ref = x * u_param.reshape(1, C, 1, 1) + c_param.reshape(1, C, 1, 1)
    assert y.shape == (N, C, H, W)
    assert jnp.allclose(y, y_ref, atol=1e-6, rtol=1e-6)

    # Non-trivial per-channel params (validates the row->channel mapping).
    u_rand = jax.random.normal(ku, (C,), dtype=jnp.float32)
    c_rand = jax.random.normal(kc, (C,), dtype=jnp.float32)
    y2 = jax.block_until_ready(constraint_affine(x, u_rand, c_rand))
    y2_ref = x * u_rand.reshape(1, C, 1, 1) + c_rand.reshape(1, C, 1, 1)
    assert jnp.allclose(y2, y2_ref, atol=1e-6, rtol=1e-6)

    # --- Path B: small / unaligned spatial dims (7x7 CNN tail) ---
    Nb, Cb, Hb, Wb = 2, 3, 7, 7
    xb = jax.random.normal(kx2, (Nb, Cb, Hb, Wb), dtype=jnp.float32)
    ub = jax.random.normal(ku2, (Cb,), dtype=jnp.float32)
    cb = jax.random.normal(kc2, (Cb,), dtype=jnp.float32)
    y3 = jax.block_until_ready(constraint_affine(xb, ub, cb))
    y3_ref = xb * ub.reshape(1, Cb, 1, 1) + cb.reshape(1, Cb, 1, 1)
    assert y3.shape == (Nb, Cb, Hb, Wb)
    assert jnp.allclose(y3, y3_ref, atol=1e-6, rtol=1e-6)

    print("KERNEL_OK")
</pallas_src>

<mosaic_0001>
module attributes {stable_mosaic.version = 11 : i64} {
  func.func @_affine_kernel(%arg0: i32, %arg1: i32, %arg2: memref<8x128xf32, #tpu.memory_space<vmem>>, %arg3: memref<8x1xf32, #tpu.memory_space<vmem>>, %arg4: memref<8x1xf32, #tpu.memory_space<vmem>>, %arg5: memref<8x128xf32, #tpu.memory_space<vmem>>) attributes {dimension_semantics = [#tpu.dimension_semantics<parallel>, #tpu.dimension_semantics<parallel>], iteration_bounds = array<i64: 1, 2>, scalar_prefetch = 0 : i64, scratch_operands = 0 : i64, tpu.core_type = #tpu.core_type<tc>, window_params = [{transform_indices = @transform_0, window_bounds = array<i64: 8, 128>}, {transform_indices = @transform_1, window_bounds = array<i64: 8, 1>}, {transform_indices = @transform_2, window_bounds = array<i64: 8, 1>}, {transform_indices = @transform_3, window_bounds = array<i64: 8, 128>}]} {
    %c0 = arith.constant 0 : index
    %c0_0 = arith.constant 0 : index
    %0 = vector.load %arg2[%c0, %c0_0] : memref<8x128xf32, #tpu.memory_space<vmem>>, vector<8x128xf32>
    %c0_1 = arith.constant 0 : index
    %c0_2 = arith.constant 0 : index
    %1 = vector.load %arg3[%c0_1, %c0_2] : memref<8x1xf32, #tpu.memory_space<vmem>>, vector<8x1xf32>
    %2 = vector.broadcast %1 : vector<8x1xf32> to vector<8x128xf32>
    %3 = arith.mulf %0, %2 : vector<8x128xf32>
    %c0_3 = arith.constant 0 : index
    %c0_4 = arith.constant 0 : index
    %4 = vector.load %arg4[%c0_3, %c0_4] : memref<8x1xf32, #tpu.memory_space<vmem>>, vector<8x1xf32>
    %5 = vector.broadcast %4 : vector<8x1xf32> to vector<8x128xf32>
    %6 = arith.addf %3, %5 : vector<8x128xf32>
    %c0_5 = arith.constant 0 : index
    %c0_6 = arith.constant 0 : index
    %7 = vector.load %arg5[%c0_5, %c0_6] : memref<8x128xf32, #tpu.memory_space<vmem>>, vector<8x128xf32>
    tpu.vector_store %arg5[%c0_5, %c0_6], %6 {strides = array<i32>} : memref<8x128xf32, #tpu.memory_space<vmem>>, vector<8x128xf32>,
    return
  }
  func.func @transform_0(%arg0: i32, %arg1: i32) -> (i32, i32) {
    %c0_i32 = arith.constant 0 : i32
    return %arg0, %arg1 : i32, i32
  }
  func.func @transform_1(%arg0: i32, %arg1: i32) -> (i32, i32) {
    %c0_i32 = arith.constant 0 : i32
    %c0_i32_0 = arith.constant 0 : i32
    return %arg0, %c0_i32 : i32, i32
  }
  func.func @transform_2(%arg0: i32, %arg1: i32) -> (i32, i32) {
    %c0_i32 = arith.constant 0 : i32
    %c0_i32_0 = arith.constant 0 : i32
    return %arg0, %c0_i32 : i32, i32
  }
  func.func @transform_3(%arg0: i32, %arg1: i32) -> (i32, i32) {
    %c0_i32 = arith.constant 0 : i32
    return %arg0, %arg1 : i32, i32
  }
}

</mosaic_0001>

<bundles_post_ra>
// kernel: tpu_custom_call.1
= control target key start
LH: loop header
LB: loop body
LE: loop exit
PB: predicated region body
PF: predicated region fallthrough
CT: control target
= control target key end

     0   :  { %8 = vsyncpa [#allocation3], 0  ;;  %s640_s0 = inlined_call_operand.vmem [shape: f32[8,256], index: 0, kind: input, shape index: {}]   ;;  %s641_s1 = inlined_call_operand.vmem [shape: f32[8,1], index: 1, kind: input, shape index: {}]   ;;  %s642_s2 = inlined_call_operand.vmem [shape: f32[8,1], index: 2, kind: input, shape index: {}]   ;;  %s643_s3 = inlined_call_operand.hbm [shape: f32[8,256], index: 3, kind: output, shape index: {}]  }
   0x1   :  { %10 = vsyncpa [#allocation3 + $0x1], 0  ;;  %s535_s12 = smov 0   ;;  %s537_s13 = smov 0  }
   0x2   :  { %s539_s14 = smov 0   ;;  %s541_s15 = smov 0  }
   0x3   :  { %s543_s16 = smov 0   ;;  %s545_s17 = smov 0  }
   0x4 LB: > { %s365_s18 = sadd.s32 4294967295, %s511_s17   ;;  %s366_s19 = sadd.s32 4294967294, %s511_s17   ;;  %s511_s17 = sphi %s545_s17, %s16_s17   ;;  %s507_s16 = sphi %s543_s16, %s650_s16   ;;  %s503_s15 = sphi %s541_s15, %s649_s15   ;;  %s499_s14 = sphi %s539_s14, %s648_s14   ;;  %s495_s13 = sphi %s537_s13, %s647_s13   ;;  %s491_s12 = sphi %s535_s12, %s646_s12  }
   0x5   : > { %s25_s20 = sadd.s32 1, %s507_s16  ;;  %s117_s21 = sadd.s32 1, %s499_s14 }
   0x6   : > { %p26_p0 = scmp.ge.s32.totalorder %s25_s20, 2  ;;  %p127_p1 = scmp.ne.s32.totalorder %s499_s14, %s495_s13 }
   0x7   : > { %p128_p2 = scmp.eq.s32.totalorder %s365_s18, 1  ;;  %p133_p3 = scmp.ne.s32.totalorder %s495_s13, %s491_s12 }
   0x8   : > { %s652_s20 = smov (%p26_p0, %s25_s20), 0  ;;  %p134_p5 = scmp.eq.s32.totalorder %s366_s19, 1 }
   0x9   : > { %p575_p4 = por %p128_p2, %p127_p1  ;;  %s113_s23 = ssub.s32 %s507_s16, %s652_s20 }
   0xa   : > { %p371_p6 = scmp.ge.s32.totalorder %s511_s17, 1  ;;  %p115_p7 = scmp.eq.s32.totalorder %s113_s23, 0 }
   0xb   : > { %p582_p8 = por %p134_p5, %p133_p3  ;;  %p177_p9 = scmp.lt.s32.totalorder %s511_s17, 3 }
   0xc   : > { %s588_s25 = scalar_select %p115_p7, %s499_s14, %s117_s21  }
   0xd   : > { %p178_p10 = pnand %p371_p6, %p177_p9 }
   0xe   : > { %p214_p11 = scmp.lt.s32.totalorder (!%p178_p10), %s503_s15, 1  ;;  %s209_s4 = sand.u32 (!%p178_p10), 1, %s495_s13  }
   0xf   : > { %181 = sbr.rel (%p178_p10) target bundleno = 165 (0xa5), region = 32  ;;  %s372_s6 = sshll.u32 (!%p178_p10), %s209_s4, 3 }
  0x10   : > { %s375_s10 = sshll.u32 (!%p178_p10), %s503_s15, 7  ;;  %s211_s11 = scalar_lea.vmem (!%p178_p10), [#allocation2], %s372_s6 }
  0x11   : > { %s260_s18 = sshll.u32 (!%p178_p10), %s211_s11, 4  ;;  %s258_s23 = scalar_lea.hbm (!%p178_p10), %s643_s3, %s375_s10  ;;  %s261_s18 = int_to_ptr.vmem [resolvable:$true] %s260_s18 }
  0x12   : > { %s245_s26 = scalar_lea.sflag (!%p178_p10), [#allocation3], %s209_s4  ;;  %s435_s27 = scalar_lea.vmem (!%p178_p10), %s261_s18, 128 }
  0x13   : > { %p436_p12 = scmp.ne.s32.totalorder (!%p178_p10), %s261_s18, %s435_s27  ;;  %s514_s28 = smov (!%p178_p10), [#allocation2]  }
  0x14   : > { %v229_v0 = vld [vmem:[%s641_s1] sm:$0xff]  ;;  %v513_v1 = vmov 0   ;;  %s215_s30 = scalar_select %p214_p11, %s503_s15, 1 }
  0x15   : > { %434 = vset.pattern.permute.xlu0 %v513_v1  ;;  %v236_v2 = vld [vmem:[%s642_s2] sm:$0xff]  ;;  %p437_p13 = pnand %p436_p12, %p575_p4  ;;  %s439_s29 = sshll.u32 %s514_s28, 4  ;;  %s440_s29 = int_to_ptr.vmem [resolvable:$false] %s439_s29 }
  0x16   : > { %232 = vperm.xlu0 %434, %v229_v0   ;;  %s373_s5 = sshll.u32 %s215_s30, 3  ;;  %s441_s15 = scalar_lea.vmem %s440_s29, 256 }
  0x17   : > { %s219_s9 = scalar_lea.vmem %s640_s0, %s373_s5  ;;  %p438_p0 = pneg %p437_p13 }
  0x18   : > { %v228_v4 = vld [vmem:[%s219_s9] sm:$0xff]  ;;  %p442_p1 = scmp.lt.s32.totalorder %s261_s18, %s440_s29  ;;  %p443_p2 = scmp.lt.s32.totalorder %s441_s15, %s435_s27 }
  0x1a   : > { %239 = vperm.xlu0 %434, %v236_v2   ;;  %p444_p3 = por %p443_p2, %p442_p1 }
  0x1c   : > { %p445_p5 = pnand %p444_p3, %p438_p0 }
  0x91   : > { %v233_v3 = vpop.permute.xlu0 %232 }
  0x92   : > { %v235_v5 = vmul.f32 %v233_v3, %v228_v4 }
  0x95   : > { %v240_v6 = vpop.permute.xlu0 %239 }
  0x96   : > { %v242_v7 = vadd.f32 %v240_v6, %v235_v5 }
  0x98   : > { %243 = vst [vmem:[%s211_s11] sm:$0xff] %v242_v7 }
  0x99   : > { %448 = shalt.err (!%p445_p5)
}
  0x9a   : > { %s449_s30 = scalar_lea.hbm %s258_s23, 128  ;;  %s453_s6 = scalar_lea.hbm %s643_s3, 256 }
  0x9b   : > { %p450_p6 = scmp.ne.s32.totalorder %s258_s23, %s449_s30  ;;  %p454_p10 = scmp.lt.s32.totalorder %s258_s23, %s643_s3 }
  0x9c   : > { %p455_p11 = scmp.lt.s32.totalorder %s453_s6, %s449_s30 }
  0x9d   : > { %p451_p7 = pnand %p450_p6, %p575_p4 }
  0x9e   : > { %p456_p12 = por %p455_p11, %p454_p10 }
  0x9f   : > { %p452_p9 = pneg %p451_p7 }
  0xa1   : > { %p457_p13 = pnand %p456_p12, %p452_p9 }
  0xa3   : > { %460 = shalt.err (!%p457_p13)
}
  0xa4   : > { %378 = dma.vmem_to_hbm [thread:$0]  (%p575_p4), %s261_s18, 128, %s258_s23, %s245_s26  }
  0xa5 PF: > { %p384_p0 = scmp.ge.s32.totalorder %s511_s17, 2  ;;  %s272_s9 = sand.u32 1, %s491_s12  }
  0xa6   : > { %s273_s10 = scalar_lea.sflag [#allocation3], %s272_s9 }
  0xa7   : > { %p381_p1 = pnand %p384_p0, %p582_p8 }
  0xa9   : > { %p382_p2 = pneg %p381_p1 }
  0xab   : > { %486 = dma.done.wait (%p382_p2), %s273_s10, 128  }
  0xac   : > { %488 = vsyncadd (%p382_p2), %s273_s10, 4294967168  ;;  %s16_s17 = sadd.s32 1, %s511_s17   ;;  %s646_s12 = smov %s495_s13 }
  0xad   : > { %p13_p3 = scmp.ge.s32.totalorder %s16_s17, 4   ;;  %s647_s13 = smov %s499_s14 }
  0xae   : > { %s648_s14 = smov %s588_s25  ;;  %s649_s15 = smov %s507_s16 }
  0xaf   : > { %s650_s16 = smov %s652_s20  ;;  %15 = sbr.rel (!%p13_p3) target bundleno = 4 (0x4), region = 73 }
  0xb4   :  { %278 = vsyncpa [#allocation3], 1 }
  0xb5   :  { %280 = vsyncpa [#allocation3 + $0x1], 1 }

</bundles_post_ra>
